<compile_context>
chip_gen: v6e
topology: v6e:2x2x1
jax: 0.10.0
libtpu: 0.0.40
codegen_flags: <defaults>
</compile_context>

<pallas_src>
import functools

import jax
import jax.numpy as jnp
from jax.experimental import pallas as pl
from jax.experimental.pallas import tpu as pltpu

AGENTS = 10
D_IN = 128
D_HID = 256
LANE = 128


def _round_up(a, m):
    return (a + m - 1) // m * m


def _qhs_kernel(x_ref, w1_ref, b1_ref, w2_ref, b2_ref, w3_ref, b3_ref, o_ref,
                *, act_dtype):
    """Fused Linear->tanh, Linear->sigmoid, Linear on one (tm, 128) batch tile."""
    cd = w1_ref.dtype          # MXU operand dtype (weights pre-cast once)
    ad = act_dtype             # transcendental dtype (bf16 halves EUP cost on v6e/v7x)

    x = x_ref[...].astype(cd)                                        # (tm, 128)

    # Layer 1: Linear(128 -> 256) + tanh. f32 accumulation on the MXU; cast the
    # pre-activation to `ad` before tanh (it was headed to bf16 anyway).
    z1 = jnp.dot(x, w1_ref[...], preferred_element_type=jnp.float32) + b1_ref[...]
    h1 = jnp.tanh(z1.astype(ad))                                     # (tm, 256)

    # Layer 2: Linear(256 -> 128) + sigmoid, with sigmoid(z) = 0.5*tanh(z/2)+0.5
    # (single EUP transcendental; the mul/add ride free on the VALU).
    z2 = jnp.dot(h1.astype(cd), w2_ref[...],
                 preferred_element_type=jnp.float32) + b2_ref[...]
    h2 = jnp.tanh((0.5 * z2).astype(ad)) * 0.5 + 0.5                 # (tm, 128)

    # Layer 3: Linear(128 -> 128-padded agents), no activation. Padded columns
    # of w3/b3 are zero, so the extra lanes are just zeros.
    z3 = jnp.dot(h2.astype(cd), w3_ref[...],
                 preferred_element_type=jnp.float32) + b3_ref[...]
    o_ref[...] = z3.astype(o_ref.dtype)                              # (tm, 128)


def prepare_params(params, compute_dtype=jnp.bfloat16):
    """One-time parameter prep (hoisted out of the per-call hot path).

    * Zero-pads w3/b3 to a lane-dense multiple of 128 output columns.
    * Casts weights to the MXU compute dtype (bf16 = performance default on all
      generations; pass jnp.float32 for a 1e-5-accurate reference mode).
    * Biases stay f32 (they are added to the f32 accumulator).

    Returns (prepared_param_tuple, agents).
    """
    w1, b1, w2, b2, w3, b3 = params
    agents = w3.shape[1]
    n_pad = _round_up(max(agents, LANE), LANE)
    w3p = jnp.pad(w3, ((0, 0), (0, n_pad - agents)))
    b3p = jnp.pad(b3, ((0, 0), (0, n_pad - agents)))
    cd = compute_dtype
    prepared = (w1.astype(cd), b1.astype(jnp.float32),
                w2.astype(cd), b2.astype(jnp.float32),
                w3p.astype(cd), b3p.astype(jnp.float32))
    return prepared, agents


def quantum_hierarchical_synchronization(x, prepared, *, tm=1024,
                                          act_dtype=None, trim_output=True):
    """x: (B, 128) float32 -> (B, agents) float32 (or (B_pad, 128) padded slab
    if trim_output=False, to skip the post-kernel slice copy).

    `prepared` is the output of prepare_params(). On v5e (no bf16 EUP/VPU)
    pass act_dtype=jnp.float32 to keep activations in f32.
    """
    (w1, b1, w2, b2, w3p, b3p), agents = prepared
    if act_dtype is None:
        act_dtype = w1.dtype

    B = x.shape[0]
    n_pad = w3p.shape[1]

    # Batch tiling: clamp to the (8-aligned) batch for tiny B; for mid/large B
    # make sure the "parallel" grid axis has >= 2 steps so both v7x TensorCores
    # get work (tiny batches aren't worth splitting: per-step overhead wins).
    tm_eff = min(tm, _round_up(B, 8))
    if B >= 512 and _round_up(B, tm_eff) // tm_eff < 2:
        tm_eff = _round_up((B + 1) // 2, 8)
    B_pad = _round_up(B, tm_eff)
    xp = jnp.pad(x, ((0, B_pad - B), (0, 0))) if B_pad != B else x

    grid = (B_pad // tm_eff,)
    kernel = functools.partial(_qhs_kernel, act_dtype=act_dtype)

    out_p = pl.pallas_call(
        kernel,
        out_shape=jax.ShapeDtypeStruct((B_pad, n_pad), jnp.float32),
        grid_spec=pltpu.PrefetchScalarGridSpec(
            num_scalar_prefetch=0,
            grid=grid,
            in_specs=[
                pl.BlockSpec((tm_eff, D_IN), lambda i: (i, 0)),     # x tile
                pl.BlockSpec((D_IN, D_HID), lambda i: (0, 0)),      # w1 (resident)
                pl.BlockSpec((1, D_HID), lambda i: (0, 0)),         # b1
                pl.BlockSpec((D_HID, D_IN), lambda i: (0, 0)),      # w2
                pl.BlockSpec((1, D_IN), lambda i: (0, 0)),          # b2
                pl.BlockSpec((D_IN, n_pad), lambda i: (0, 0)),      # w3 (padded)
                pl.BlockSpec((1, n_pad), lambda i: (0, 0)),         # b3 (padded)
            ],
            out_specs=pl.BlockSpec((tm_eff, n_pad), lambda i: (i, 0)),
        ),
        compiler_params=pltpu.CompilerParams(
            # Shard the batch-tile axis across TensorCores (v7x megacore).
            dimension_semantics=("parallel",),
            # v5e's scoped-VMEM default is only 16 MiB; 32 MiB comfortably
            # covers tm up to ~4096 on every generation's physical VMEM.
            vmem_limit_bytes=32 << 20),
    )(xp, w1, b1, w2, b2, w3p, b3p)

    if not trim_output:
        return out_p
    return out_p[:B, :agents]


def init_params(key, agents=AGENTS):
    """Deterministic PyTorch-style uniform(-1/sqrt(fan_in), 1/sqrt(fan_in)) init."""
    ks = jax.random.split(key, 6)

    def lin(kw, kb, fan_in, fan_out):
        bound = 1.0 / jnp.sqrt(fan_in)
        w = jax.random.uniform(kw, (fan_in, fan_out), jnp.float32, -bound, bound)
        b = jax.random.uniform(kb, (1, fan_out), jnp.float32, -bound, bound)
        return w, b

    w1, b1 = lin(ks[0], ks[1], D_IN, D_HID)
    w2, b2 = lin(ks[2], ks[3], D_HID, D_IN)
    w3, b3 = lin(ks[4], ks[5], D_IN, agents)
    return (w1, b1, w2, b2, w3, b3)


def reference_forward(x, params):
    w1, b1, w2, b2, w3, b3 = params
    h1 = jnp.tanh(x @ w1 + b1)
    h2 = jax.nn.sigmoid(h1 @ w2 + b2)
    return h2 @ w3 + b3


if __name__ == "__main__":
    key = jax.random.PRNGKey(0)
    k_param, k_x1, k_x2, k_x3 = jax.random.split(key, 4)

    raw_params = init_params(k_param, agents=AGENTS)

    # --- f32 reference mode (tight tolerance) -------------------------------
    prep_f32 = prepare_params(raw_params, compute_dtype=jnp.float32)

    # Case 1: swarm_input (batch=8, features=128) — matches the PyTorch module.
    x = jax.random.normal(k_x1, (8, D_IN), dtype=jnp.float32)
    out = jax.block_until_ready(quantum_hierarchical_synchronization(x, prep_f32))
    ref = reference_forward(x, raw_params)
    assert out.shape == (8, AGENTS)
    assert jnp.allclose(out, ref, atol=1e-5, rtol=1e-5)

    # Case 2: batch not divisible by the tile -> exercises batch padding and a
    # multi-step parallel grid.
    x2 = jax.random.normal(k_x2, (40, D_IN), dtype=jnp.float32)
    out2 = jax.block_until_ready(
        quantum_hierarchical_synchronization(x2, prep_f32, tm=16))
    ref2 = reference_forward(x2, raw_params)
    assert out2.shape == (40, AGENTS)
    assert jnp.allclose(out2, ref2, atol=1e-5, rtol=1e-5)

    # --- bf16 performance mode + v7x two-TC split path (B >= 512 -> grid=2) --
    prep_bf16 = prepare_params(raw_params, compute_dtype=jnp.bfloat16)
    x3 = jax.random.normal(k_x3, (600, D_IN), dtype=jnp.float32)
    out3 = jax.block_until_ready(
        quantum_hierarchical_synchronization(x3, prep_bf16))
    ref3 = reference_forward(x3, raw_params)
    assert out3.shape == (600, AGENTS)
    assert jnp.allclose(out3, ref3, atol=5e-2, rtol=5e-2)

    print("KERNEL_OK")
</pallas_src>

<mosaic_0001>
module attributes {stable_mosaic.version = 11 : i64} {
  func.func @_qhs_kernel(%arg0: i32, %arg1: memref<8x128xf32, #tpu.memory_space<vmem>>, %arg2: memref<128x256xf32, #tpu.memory_space<vmem>>, %arg3: memref<1x256xf32, #tpu.memory_space<vmem>>, %arg4: memref<256x128xf32, #tpu.memory_space<vmem>>, %arg5: memref<1x128xf32, #tpu.memory_space<vmem>>, %arg6: memref<128x128xf32, #tpu.memory_space<vmem>>, %arg7: memref<1x128xf32, #tpu.memory_space<vmem>>, %arg8: memref<8x128xf32, #tpu.memory_space<vmem>>) attributes {dimension_semantics = [#tpu.dimension_semantics<parallel>], iteration_bounds = array<i64: 1>, scalar_prefetch = 0 : i64, scratch_operands = 0 : i64, tpu.core_type = #tpu.core_type<tc>, window_params = [{transform_indices = @transform_0, window_bounds = array<i64: 8, 128>}, {pipeline_mode = #tpu.pipeline_mode<synchronous>, transform_indices = @transform_1, window_bounds = array<i64: 128, 256>}, {pipeline_mode = #tpu.pipeline_mode<synchronous>, transform_indices = @transform_2, window_bounds = array<i64: 1, 256>}, {pipeline_mode = #tpu.pipeline_mode<synchronous>, transform_indices = @transform_3, window_bounds = array<i64: 256, 128>}, {pipeline_mode = #tpu.pipeline_mode<synchronous>, transform_indices = @transform_4, window_bounds = array<i64: 1, 128>}, {pipeline_mode = #tpu.pipeline_mode<synchronous>, transform_indices = @transform_5, window_bounds = array<i64: 128, 128>}, {pipeline_mode = #tpu.pipeline_mode<synchronous>, transform_indices = @transform_6, window_bounds = array<i64: 1, 128>}, {transform_indices = @transform_7, window_bounds = array<i64: 8, 128>}]} {
    %c0 = arith.constant 0 : index
    %c0_0 = arith.constant 0 : index
    %0 = vector.load %arg1[%c0, %c0_0] : memref<8x128xf32, #tpu.memory_space<vmem>>, vector<8x128xf32>
    %c0_1 = arith.constant 0 : index
    %c0_2 = arith.constant 0 : index
    %1 = vector.load %arg2[%c0_1, %c0_2] : memref<128x256xf32, #tpu.memory_space<vmem>>, vector<128x256xf32>
    %cst = arith.constant dense<0.000000e+00> : vector<8x256xf32>
    %2 = tpu.matmul %0, %1, %cst {dimension_numbers = #tpu.dot_dimension_numbers<[1], [0], [0], [1], [0, 0, 1, 1], [], []>} : vector<8x128xf32>, vector<128x256xf32>, vector<8x256xf32> -> vector<8x256xf32>
    %c0_3 = arith.constant 0 : index
    %c0_4 = arith.constant 0 : index
    %3 = vector.load %arg3[%c0_3, %c0_4] : memref<1x256xf32, #tpu.memory_space<vmem>>, vector<1x256xf32>
    %4 = vector.broadcast %3 : vector<1x256xf32> to vector<8x256xf32>
    %5 = arith.addf %2, %4 : vector<8x256xf32>
    %6 = math.tanh %5 : vector<8x256xf32>
    %c0_5 = arith.constant 0 : index
    %c0_6 = arith.constant 0 : index
    %7 = vector.load %arg4[%c0_5, %c0_6] : memref<256x128xf32, #tpu.memory_space<vmem>>, vector<256x128xf32>
    %cst_7 = arith.constant dense<0.000000e+00> : vector<8x128xf32>
    %8 = tpu.matmul %6, %7, %cst_7 {dimension_numbers = #tpu.dot_dimension_numbers<[1], [0], [0], [1], [0, 0, 1, 1], [], []>} : vector<8x256xf32>, vector<256x128xf32>, vector<8x128xf32> -> vector<8x128xf32>
    %c0_8 = arith.constant 0 : index
    %c0_9 = arith.constant 0 : index
    %9 = vector.load %arg5[%c0_8, %c0_9] : memref<1x128xf32, #tpu.memory_space<vmem>>, vector<1x128xf32>
    %10 = vector.broadcast %9 : vector<1x128xf32> to vector<8x128xf32>
    %11 = arith.addf %8, %10 : vector<8x128xf32>
    %cst_10 = arith.constant 5.000000e-01 : f32
    %12 = vector.broadcast %cst_10 : f32 to vector<8x128xf32>
    %13 = arith.mulf %12, %11 : vector<8x128xf32>
    %14 = math.tanh %13 : vector<8x128xf32>
    %cst_11 = arith.constant 5.000000e-01 : f32
    %15 = vector.broadcast %cst_11 : f32 to vector<8x128xf32>
    %16 = arith.mulf %14, %15 : vector<8x128xf32>
    %cst_12 = arith.constant 5.000000e-01 : f32
    %17 = vector.broadcast %cst_12 : f32 to vector<8x128xf32>
    %18 = arith.addf %16, %17 : vector<8x128xf32>
    %c0_13 = arith.constant 0 : index
    %c0_14 = arith.constant 0 : index
    %19 = vector.load %arg6[%c0_13, %c0_14] : memref<128x128xf32, #tpu.memory_space<vmem>>, vector<128x128xf32>
    %cst_15 = arith.constant dense<0.000000e+00> : vector<8x128xf32>
    %20 = tpu.matmul %18, %19, %cst_15 {dimension_numbers = #tpu.dot_dimension_numbers<[1], [0], [0], [1], [0, 0, 1, 1], [], []>} : vector<8x128xf32>, vector<128x128xf32>, vector<8x128xf32> -> vector<8x128xf32>
    %c0_16 = arith.constant 0 : index
    %c0_17 = arith.constant 0 : index
    %21 = vector.load %arg7[%c0_16, %c0_17] : memref<1x128xf32, #tpu.memory_space<vmem>>, vector<1x128xf32>
    %22 = vector.broadcast %21 : vector<1x128xf32> to vector<8x128xf32>
    %23 = arith.addf %20, %22 : vector<8x128xf32>
    %c0_18 = arith.constant 0 : index
    %c0_19 = arith.constant 0 : index
    %24 = vector.load %arg8[%c0_18, %c0_19] : memref<8x128xf32, #tpu.memory_space<vmem>>, vector<8x128xf32>
    tpu.vector_store %arg8[%c0_18, %c0_19], %23 {strides = array<i32>} : memref<8x128xf32, #tpu.memory_space<vmem>>, vector<8x128xf32>,
    return
  }
  func.func @transform_0(%arg0: i32) -> (i32, i32) {
    %c0_i32 = arith.constant 0 : i32
    %c0_i32_0 = arith.constant 0 : i32
    return %arg0, %c0_i32 : i32, i32
  }
  func.func @transform_1(%arg0: i32) -> (i32, i32) {
    %c0_i32 = arith.constant 0 : i32
    %c0_i32_0 = arith.constant 0 : i32
    %c0_i32_1 = arith.constant 0 : i32
    return %c0_i32, %c0_i32_0 : i32, i32
  }
  func.func @transform_2(%arg0: i32) -> (i32, i32) {
    %c0_i32 = arith.constant 0 : i32
    %c0_i32_0 = arith.constant 0 : i32
    %c0_i32_1 = arith.constant 0 : i32
    return %c0_i32, %c0_i32_0 : i32, i32
  }
  func.func @transform_3(%arg0: i32) -> (i32, i32) {
    %c0_i32 = arith.constant 0 : i32
    %c0_i32_0 = arith.constant 0 : i32
    %c0_i32_1 = arith.constant 0 : i32
    return %c0_i32, %c0_i32_0 : i32, i32
  }
  func.func @transform_4(%arg0: i32) -> (i32, i32) {
    %c0_i32 = arith.constant 0 : i32
    %c0_i32_0 = arith.constant 0 : i32
    %c0_i32_1 = arith.constant 0 : i32
    return %c0_i32, %c0_i32_0 : i32, i32
  }
  func.func @transform_5(%arg0: i32) -> (i32, i32) {
    %c0_i32 = arith.constant 0 : i32
    %c0_i32_0 = arith.constant 0 : i32
    %c0_i32_1 = arith.constant 0 : i32
    return %c0_i32, %c0_i32_0 : i32, i32
  }
  func.func @transform_6(%arg0: i32) -> (i32, i32) {
    %c0_i32 = arith.constant 0 : i32
    %c0_i32_0 = arith.constant 0 : i32
    %c0_i32_1 = arith.constant 0 : i32
    return %c0_i32, %c0_i32_0 : i32, i32
  }
  func.func @transform_7(%arg0: i32) -> (i32, i32) {
    %c0_i32 = arith.constant 0 : i32
    %c0_i32_0 = arith.constant 0 : i32
    return %arg0, %c0_i32 : i32, i32
  }
}

</mosaic_0001>

<bundles_post_ra>
// kernel: tpu_custom_call.1
= control target key start
LH: loop header
LB: loop body
LE: loop exit
PB: predicated region body
PF: predicated region fallthrough
CT: control target
= control target key end

     0   :  { %12 = vsyncpa [#allocation3], 0  ;;  %s729_s0 = inlined_call_operand.hbm [shape: f32[8,128], index: 0, kind: input, shape index: {}]   ;;  %s730_s1 = inlined_call_operand.hbm [shape: f32[128,256], index: 1, kind: input, shape index: {}]   ;;  %s731_s2 = inlined_call_operand.vmem [shape: f32[1,256], index: 2, kind: input, shape index: {}]   ;;  %s732_s3 = inlined_call_operand.hbm [shape: f32[256,128], index: 3, kind: input, shape index: {}]   ;;  %s733_s4 = inlined_call_operand.vmem [shape: f32[1,128], index: 4, kind: input, shape index: {}]   ;;  %s734_s5 = inlined_call_operand.hbm [shape: f32[128,128], index: 5, kind: input, shape index: {}]   ;;  %s735_s6 = inlined_call_operand.vmem [shape: f32[1,128], index: 6, kind: input, shape index: {}]   ;;  %s736_s7 = inlined_call_operand.hbm [shape: f32[8,128], index: 7, kind: output, shape index: {}]  }
   0x1   :  { %13 = vsyncpa [#allocation6], 0 }
   0x2   :  { %14 = vsyncpa [#allocation9], 0 }
   0x3   :  { %15 = vsyncpa [#allocation4], 0  ;;  %s636_s24 = smov [#allocation5]  }
   0x4   :  { %s31_s25 = sshll.u32 %s636_s24, 4  ;;  %s32_s25 = int_to_ptr.vmem [resolvable:$true] %s31_s25 }
   0x5   :  { %s536_s26 = scalar_lea.vmem %s32_s25, 4096  ;;  %p541_p1 = scmp.lt.s32.totalorder %s32_s25, %s32_s25 }
   0x6   :  { %p537_p0 = scmp.ne.s32.totalorder %s32_s25, %s536_s26  ;;  %p542_p2 = scmp.lt.s32.totalorder %s536_s26, %s536_s26 }
   0x8   :  { %p543_p3 = por %p542_p2, %p541_p1 }
   0xa   :  { %p544_p4 = pnand %p543_p3, %p537_p0 }
   0xc   :  { %547 = shalt.err (!%p544_p4)
}
   0xd   :  { %s637_s27 = smov 256   ;;  %s638_s28 = smov 16  }
   0xe   :  { %37 = dma.hbm_to_vmem [thread:$0]  %s730_s1, 4096, %s32_s25, [#allocation6], %s637_s27, %s637_s27, %s638_s28  }
   0xf   :  { %s639_s8 = smov [#allocation2]   ;;  %s640_s10 = smov [#allocation7]  }
  0x10   :  { %s22_s9 = sshll.u32 %s639_s8, 4  ;;  %s45_s11 = sshll.u32 %s640_s10, 4  ;;  %s23_s9 = int_to_ptr.vmem [resolvable:$true] %s22_s9  ;;  %s46_s11 = int_to_ptr.vmem [resolvable:$true] %s45_s11 }
  0x11   :  { %s556_s12 = scalar_lea.vmem %s23_s9, 128  ;;  %p561_p6 = scmp.lt.s32.totalorder %s23_s9, %s23_s9 }
  0x12   :  { %p557_p5 = scmp.ne.s32.totalorder %s23_s9, %s556_s12  ;;  %p562_p7 = scmp.lt.s32.totalorder %s556_s12, %s556_s12 }
  0x14   :  { %p563_p8 = por %p562_p7, %p561_p6 }
  0x16   :  { %p564_p9 = pnand %p563_p8, %p557_p5 }
  0x18   :  { %567 = shalt.err (!%p564_p9)
}
  0x19   :  { %25 = dma.hbm_to_vmem [thread:$0]  %s729_s0, 128, %s23_s9, [#allocation3]  }
  0x1a   :  { %s576_s15 = scalar_lea.vmem %s46_s11, 4096  ;;  %p581_p11 = scmp.lt.s32.totalorder %s46_s11, %s46_s11 }
  0x1b   :  { %p577_p10 = scmp.ne.s32.totalorder %s46_s11, %s576_s15  ;;  %p582_p12 = scmp.lt.s32.totalorder %s576_s15, %s576_s15 }
  0x1d   :  { %p583_p13 = por %p582_p12, %p581_p11 }
  0x1f   :  { %p584_p0 = pnand %p583_p13, %p577_p10 }
  0x21   :  { %587 = shalt.err (!%p584_p0)
}
  0x22   :  { %s641_s1 = smov 128   ;;  %s642_s16 = smov 8  }
  0x23   :  { %51 = dma.hbm_to_vmem [thread:$0]  %s732_s3, 4096, %s46_s11, [#allocation6], %s641_s1, %s641_s1, %s642_s16  }
  0x24   :  { %s643_s19 = smov [#allocation8]  }
  0x25   :  { %s59_s20 = sshll.u32 %s643_s19, 4  ;;  %s60_s20 = int_to_ptr.vmem [resolvable:$true] %s59_s20 }
  0x26   :  { %s596_s21 = scalar_lea.vmem %s60_s20, 2048  ;;  %p601_p2 = scmp.lt.s32.totalorder %s60_s20, %s60_s20 }
  0x27   :  { %p597_p1 = scmp.ne.s32.totalorder %s60_s20, %s596_s21  ;;  %p602_p3 = scmp.lt.s32.totalorder %s596_s21, %s596_s21 }
  0x29   :  { %p603_p4 = por %p602_p3, %p601_p2 }
  0x2b   :  { %p604_p5 = pnand %p603_p4, %p597_p1 }
  0x2d   :  { %607 = shalt.err (!%p604_p5)
}
  0x2e   :  { %65 = dma.hbm_to_vmem [thread:$0]  %s734_s5, 2048, %s60_s20, [#allocation9], %s641_s1, %s641_s1, %s642_s16  }
  0x2f   :  { %628 = dma.done.wait [#allocation3], 128  }
  0x30   :  { %629 = vsyncadd [#allocation3], 4294967168 }
  0x31   :  { %630 = dma.done.wait [#allocation6], 8192  }
  0x32   :  { %631 = vsyncadd [#allocation6], 4294959104 }
  0x33   :  { %632 = dma.done.wait [#allocation9], 2048  }
  0x34   :  { %633 = vsyncadd [#allocation9], 4294965248  ;;  %v644_v0 = vmov 0.0   ;;  %v112_v1 = vld [vmem:[#allocation5 + $0xf8] sm:$0xff]  ;;  %v111_v2 = vld [vmem:[#allocation5 + $0xf0] sm:$0xff]  ;;  %vm645_vm0 = vmmov 0  }
  0x35   :  { %189 = vmatprep.mubr.f32.mxu0 %v644_v0  ;;  %v110_v3 = vld [vmem:[#allocation5 + $0xe8] sm:$0xff]  ;;  %125 = vmatprep.subr.mxu0 %v112_v1  ;;  %v109_v4 = vld [vmem:[#allocation5 + $0xe0] sm:$0xff]  ;;  %v108_v5 = vld [vmem:[#allocation5 + $0xd8] sm:$0xff]  ;;  %s646_s26 = smov [#allocation10]  }
  0x36   :  { %126 = vmatpush1.msra.mxu0 %v111_v2  ;;  %v107_v6 = vld [vmem:[#allocation5 + $0xd0] sm:$0xff]  ;;  %v106_v7 = vld [vmem:[#allocation5 + $0xc8] sm:$0xff]  ;;  %v105_v8 = vld [vmem:[#allocation5 + $0xc0] sm:$0xff]  ;;  %s411_s27 = sshll.u32 %s646_s26, 4  ;;  %s412_s27 = int_to_ptr.vmem [resolvable:$true] %s411_s27 }
  0x37   :  { %127 = vmatprep.subr.mxu0 %v110_v3  ;;  %v104_v9 = vld [vmem:[#allocation5 + $0xb8] sm:$0xff]  ;;  %v103_v10 = vld [vmem:[#allocation5 + $0xb0] sm:$0xff]  ;;  %v102_v11 = vld [vmem:[#allocation5 + $0xa8] sm:$0xff]  ;;  %p613_p7 = scmp.lt.s32.totalorder %s412_s27, %s412_s27 }
  0x38   :  { %128 = vmatpush1.msra.mxu0 %v109_v4  ;;  %v101_v12 = vld [vmem:[#allocation5 + $0xa0] sm:$0xff]  ;;  %v100_v13 = vld [vmem:[#allocation5 + $0x98] sm:$0xff]  ;;  %v99_v14 = vld [vmem:[#allocation5 + $0x90] sm:$0xff] }
  0x39   :  { %129 = vmatprep.subr.mxu0 %v108_v5  ;;  %v229_v15 = vld [vmem:[#allocation7 + $0xf8] sm:$0xff]  ;;  %v228_v17 = vld [vmem:[#allocation7 + $0xf0] sm:$0xff]  ;;  %v98_v18 = vld [vmem:[#allocation5 + $0x88] sm:$0xff]  ;;  %v115_v5 = vlaneseq }
  0x3a   :  { %130 = vmatpush1.msra.mxu0 %v107_v6  ;;  %v213_v16 = vld [vmem:[#allocation7 + $0x78] sm:$0xff]  ;;  %424 = vmatprep.subr.mxu1 %v229_v15  ;;  %v212_v19 = vld [vmem:[#allocation7 + $0x70] sm:$0xff]  ;;  %v97_v20 = vld [vmem:[#allocation5 + $0x80] sm:$0xff] }
  0x3b   :  { %131 = vmatprep.subr.mxu0 %v106_v7  ;;  %425 = vmatpush3.msra.mxu1 %v213_v16  ;;  %v227_v21 = vld [vmem:[#allocation7 + $0xe8] sm:$0xff]  ;;  %v96_v22 = vld [vmem:[#allocation5 + $0x78] sm:$0xff]  ;;  %v95_v24 = vld [vmem:[#allocation5 + $0x70] sm:$0xff]  ;;  %v116_v6 = vshrl.u32 %v115_v5, 7 }
  0x3c   :  { %132 = vmatpush1.msra.mxu0 %v105_v8  ;;  %426 = vmatprep.subr.mxu1 %v228_v17  ;;  %v211_v23 = vld [vmem:[#allocation7 + $0x68] sm:$0xff]  ;;  %v226_v25 = vld [vmem:[#allocation7 + $0xe0] sm:$0xff]  ;;  %v225_v29 = vld [vmem:[#allocation7 + $0xd8] sm:$0xff] }
  0x3d   :  { %133 = vmatprep.subr.mxu0 %v104_v9  ;;  %427 = vmatpush3.msra.mxu1 %v212_v19  ;;  %v94_v26 = vld [vmem:[#allocation5 + $0x68] sm:$0xff]  ;;  %v210_v27 = vld [vmem:[#allocation7 + $0x60] sm:$0xff]  ;;  %v92_v30 = vld [vmem:[#allocation5 + $0x58] sm:$0xff]  ;;  %v117_v7 = vsub.s32 0, %v116_v6  ;;  %v121_v9 = vsub.s32 1, %v116_v6 }
  0x3e   :  { %134 = vmatpush1.msra.mxu0 %v103_v10  ;;  %428 = vmatprep.subr.mxu1 %v227_v21  ;;  %v93_v28 = vld [vmem:[#allocation5 + $0x60] sm:$0xff]  ;;  %v209_v31 = vld [vmem:[#allocation7 + $0x58] sm:$0xff]  ;;  %v91_v32 = vld [vmem:[#allocation5 + $0x50] sm:$0xff] }
  0x3f   :  { %135 = vmatprep.subr.mxu0 %v102_v11  ;;  %429 = vmatpush3.msra.mxu1 %v211_v23  ;;  %v224_v33 = vld [vmem:[#allocation7 + $0xd0] sm:$0xff]  ;;  %v90_v34 = vld [vmem:[#allocation5 + $0x48] sm:$0xff]  ;;  %v89_v36 = vld [vmem:[#allocation5 + $0x40] sm:$0xff] }
  0x40   :  { %136 = vmatpush1.msra.mxu0 %v101_v12  ;;  %430 = vmatprep.subr.mxu1 %v226_v25  ;;  %v208_v35 = vld [vmem:[#allocation7 + $0x50] sm:$0xff]  ;;  %v88_v37 = vld [vmem:[#allocation5 + $0x38] sm:$0xff]  ;;  %v86_v39 = vld [vmem:[#allocation5 + $0x28] sm:$0xff] }
  0x41   :  { %137 = vmatprep.subr.mxu0 %v100_v13  ;;  %431 = vmatpush3.msra.mxu1 %v210_v27  ;;  %v87_v38 = vld [vmem:[#allocation5 + $0x30] sm:$0xff]  ;;  %v85_v40 = vld [vmem:[#allocation5 + $0x20] sm:$0xff]  ;;  %v84_v41 = vld [vmem:[#allocation5 + $0x18] sm:$0xff] }
  0x42   :  { %138 = vmatpush1.msra.mxu0 %v99_v14  ;;  %432 = vmatprep.subr.mxu1 %v225_v29  ;;  %v83_v42 = vld [vmem:[#allocation5 + $0x10] sm:$0xff]  ;;  %v82_v43 = vld [vmem:[#allocation5 + $0x8] sm:$0xff]  ;;  %v81_v44 = vld [vmem:[#allocation5] sm:$0xff] }
  0x43   :  { %139 = vmatprep.subr.mxu0 %v98_v18  ;;  %433 = vmatpush3.msra.mxu1 %v209_v31  ;;  %v80_v45 = vld [vmem:[#allocation2] sm:$0xff]  ;;  %v223_v46 = vld [vmem:[#allocation7 + $0xc8] sm:$0xff]  ;;  %v222_v48 = vld [vmem:[#allocation7 + $0xc0] sm:$0xff] }
  0x44   :  { %140 = vmatpush1.msra.mxu0 %v97_v20  ;;  %434 = vmatprep.subr.mxu1 %v224_v33  ;;  %v207_v47 = vld [vmem:[#allocation7 + $0x48] sm:$0xff]  ;;  %v206_v49 = vld [vmem:[#allocation7 + $0x40] sm:$0xff]  ;;  %v221_v50 = vld [vmem:[#allocation7 + $0xb8] sm:$0xff] }
  0x45   :  { %141 = vmatprep.subr.mxu0 %v96_v22  ;;  %435 = vmatpush3.msra.mxu1 %v208_v35  ;;  %v205_v51 = vld [vmem:[#allocation7 + $0x38] sm:$0xff]  ;;  %v220_v52 = vld [vmem:[#allocation7 + $0xb0] sm:$0xff]  ;;  %v219_v54 = vld [vmem:[#allocation7 + $0xa8] sm:$0xff] }
  0x46   :  { %142 = vmatpush1.msra.mxu0 %v95_v24  ;;  %436 = vmatprep.subr.mxu1 %v223_v46  ;;  %v204_v53 = vld [vmem:[#allocation7 + $0x30] sm:$0xff]  ;;  %v203_v55 = vld [vmem:[#allocation7 + $0x28] sm:$0xff]  ;;  %v218_v56 = vld [vmem:[#allocation7 + $0xa0] sm:$0xff] }
  0x47   :  { %143 = vmatprep.subr.mxu0 %v94_v26  ;;  %437 = vmatpush3.msra.mxu1 %v207_v47  ;;  %v202_v57 = vld [vmem:[#allocation7 + $0x20] sm:$0xff]  ;;  %v217_v58 = vld [vmem:[#allocation7 + $0x98] sm:$0xff]  ;;  %v216_v60 = vld [vmem:[#allocation7 + $0x90] sm:$0xff] }
  0x48   :  { %144 = vmatpush1.msra.mxu0 %v93_v28  ;;  %438 = vmatprep.subr.mxu1 %v222_v48  ;;  %v201_v59 = vld [vmem:[#allocation7 + $0x18] sm:$0xff]  ;;  %v200_v61 = vld [vmem:[#allocation7 + $0x10] sm:$0xff]  ;;  %v215_v62 = vld [vmem:[#allocation7 + $0x88] sm:$0xff] }
  0x49   :  { %145 = vmatprep.subr.mxu0 %v92_v30  ;;  %439 = vmatpush3.msra.mxu1 %v206_v49  ;;  %v199_v63 = vld [vmem:[#allocation7 + $0x8] sm:$0xff]  ;;  %v214_v1 = vld [vmem:[#allocation7 + $0x80] sm:$0xff]  ;;  %v326_v3 = vld [vmem:[#allocation8 + $0x78] sm:$0xff] }
  0x4a   :  { %146 = vmatpush1.msra.mxu0 %v91_v32  ;;  %440 = vmatprep.subr.mxu1 %v221_v50  ;;  %v198_v2 = vld [vmem:[#allocation7] sm:$0xff]  ;;  %v325_v4 = vld [vmem:[#allocation8 + $0x70] sm:$0xff]  ;;  %v113_v8 = vld [vmem:[%s731_s2] sm:$0x3] }
  0x4b   :  { %147 = vmatprep.subr.mxu0 %v90_v34  ;;  %441 = vmatpush3.msra.mxu1 %v205_v51  ;;  %v118_v10 = vrot.slane %v113_v8, %v117_v7  ;;  %v122_v11 = vrot.slane %v113_v8, %v121_v9  ;;  %v324_v18 = vld [vmem:[#allocation8 + $0x68] sm:$0xff]  ;;  %v323_v19 = vld [vmem:[#allocation8 + $0x60] sm:$0xff]  ;;  %v322_v20 = vld [vmem:[#allocation8 + $0x58] sm:$0xff] }
  0x4c   :  { %148 = vmatpush1.msra.mxu0 %v89_v36  ;;  %442 = vmatprep.subr.mxu1 %v220_v52  ;;  %v321_v21 = vld [vmem:[#allocation8 + $0x50] sm:$0xff]  ;;  %v320_v22 = vld [vmem:[#allocation8 + $0x48] sm:$0xff]  ;;  %v319_v23 = vld [vmem:[#allocation8 + $0x40] sm:$0xff] }
  0x4d   :  { %149 = vmatprep.subr.mxu0 %v88_v37  ;;  %443 = vmatpush3.msra.mxu1 %v204_v53  ;;  %v318_v24 = vld [vmem:[#allocation8 + $0x38] sm:$0xff]  ;;  %v317_v25 = vld [vmem:[#allocation8 + $0x30] sm:$0xff]  ;;  %v316_v26 = vld [vmem:[#allocation8 + $0x28] sm:$0xff] }
  0x4e   :  { %150 = vmatpush1.msra.mxu0 %v87_v38  ;;  %444 = vmatprep.subr.mxu1 %v219_v54  ;;  %v315_v27 = vld [vmem:[#allocation8 + $0x20] sm:$0xff]  ;;  %v314_v28 = vld [vmem:[#allocation8 + $0x18] sm:$0xff]  ;;  %v313_v29 = vld [vmem:[#allocation8 + $0x10] sm:$0xff] }
  0x4f   :  { %151 = vmatprep.subr.mxu0 %v86_v39  ;;  %445 = vmatpush3.msra.mxu1 %v203_v55  ;;  %v312_v30 = vld [vmem:[#allocation8 + $0x8] sm:$0xff]  ;;  %v311_v31 = vld [vmem:[#allocation8] sm:$0xff]  ;;  %v422_v33 = vld [vmem:[%s733_s4] ss:$0 sm:$0xff]  ;;  %s608_s4 = scalar_lea.vmem %s412_s27, 128 }
  0x50   :  { %152 = vmatpush1.msra.mxu0 %v85_v40  ;;  %446 = vmatprep.subr.mxu1 %v218_v56  ;;  %p609_p6 = scmp.ne.s32.totalorder %s412_s27, %s608_s4  ;;  %p614_p8 = scmp.lt.s32.totalorder %s608_s4, %s608_s4 }
  0x51   :  { %153 = vmatprep.subr.mxu0 %v84_v41  ;;  %447 = vmatpush3.msra.mxu1 %v202_v57  ;;  %v423_v41 = vld [vmem:[%s735_s6] ss:$0 sm:$0xff] }
  0x52   :  { %154 = vmatpush1.msra.mxu0 %v83_v42  ;;  %448 = vmatprep.subr.mxu1 %v217_v58  ;;  %p615_p9 = por %p614_p8, %p613_p7 }
  0x53   :  { %155 = vmatprep.subr.mxu0 %v82_v43  ;;  %449 = vmatpush3.msra.mxu1 %v201_v59 }
  0x54   :  { %156 = vmatpush1.msra.mxu0 %v81_v44  ;;  %450 = vmatprep.subr.mxu1 %v216_v60  ;;  %p616_p10 = pnand %p615_p9, %p609_p6 }
  0x55   :  { %190 = vmatmul.mubr.f32.vlgmr.msra.gmra.mxu0 %v80_v45  ;;  %476 = vmatprep.subr.mxu0 %v644_v0 }
  0x56   :  { %451 = vmatpush3.msra.mxu1 %v200_v61  ;;  %477 = vmatpush3.msra.mxu0 %v326_v3 }
  0x57   :  { %452 = vmatprep.subr.mxu1 %v215_v62  ;;  %478 = vmatprep.subr.mxu0 %v644_v0 }
  0x58   :  { %453 = vmatpush3.msra.mxu1 %v199_v63  ;;  %479 = vmatpush3.msra.mxu0 %v325_v4 }
  0x59   :  { %454 = vmatprep.subr.mxu1 %v214_v1  ;;  %480 = vmatprep.subr.mxu0 %v644_v0 }
  0x5a   :  { %455 = vmatpush3.msra.mxu1 %v198_v2  ;;  %481 = vmatpush3.msra.mxu0 %v324_v18 }
  0x5b   :  { %482 = vmatprep.subr.mxu0 %v644_v0  ;;  %508 = vmatprep.mubr.msk.f32.mxu0 %vm645_vm0, %v644_v0 }
  0x5c   :  { %483 = vmatpush3.msra.mxu0 %v323_v19 }
  0x5d   :  { %484 = vmatprep.subr.mxu0 %v644_v0 }
  0x5e   :  { %485 = vmatpush3.msra.mxu0 %v322_v20 }
  0x5f   :  { %486 = vmatprep.subr.mxu0 %v644_v0 }
  0x60   :  { %487 = vmatpush3.msra.mxu0 %v321_v21 }
  0x61   :  { %488 = vmatprep.subr.mxu0 %v644_v0 }
  0x62   :  { %489 = vmatpush3.msra.mxu0 %v320_v22 }
  0x63   :  { %490 = vmatprep.subr.mxu0 %v644_v0 }
  0x64   :  { %491 = vmatpush3.msra.mxu0 %v319_v23 }
  0x65   :  { %492 = vmatprep.subr.mxu0 %v644_v0 }
  0x66   :  { %493 = vmatpush3.msra.mxu0 %v318_v24 }
  0x67   :  { %494 = vmatprep.subr.mxu0 %v644_v0 }
  0x68   :  { %495 = vmatpush3.msra.mxu0 %v317_v25 }
  0x69   :  { %496 = vmatprep.subr.mxu0 %v644_v0 }
  0x6a   :  { %497 = vmatpush3.msra.mxu0 %v316_v26 }
  0x6b   :  { %498 = vmatprep.subr.mxu0 %v644_v0 }
  0x6c   :  { %499 = vmatpush3.msra.mxu0 %v315_v27 }
  0x6d   :  { %500 = vmatprep.subr.mxu0 %v644_v0 }
  0x6e   :  { %501 = vmatpush3.msra.mxu0 %v314_v28 }
  0x6f   :  { %502 = vmatprep.subr.mxu0 %v644_v0 }
  0x70   :  { %503 = vmatpush3.msra.mxu0 %v313_v29 }
  0x71   :  { %504 = vmatprep.subr.mxu0 %v644_v0 }
  0x72   :  { %505 = vmatpush3.msra.mxu0 %v312_v30 }
  0x73   :  { %506 = vmatprep.subr.mxu0 %v644_v0 }
  0x74   :  { %507 = vmatpush3.msra.mxu0 %v311_v31 }
 0x115   :  { %v191_v12 = vpop.f32.mrf.mxu0 }
 0x116   :  { %v192_v13 = vadd.f32 %v191_v12, %v118_v10 }
 0x117   :  { %v193_v14 = vpop.f32.mrf.mxu0 }
 0x118   :  { %v194_v15 = vadd.f32 %v193_v14, %v122_v11 }
 0x11a   :  { %522 = vtanh.f32 %v194_v15 }
 0x11b   :  { %524 = vtanh.f32 %v192_v13 }
 0x127   :  { %v523_v16 = vpop.eup %522 }
 0x128   :  { %v525_v17 = vpop.eup %524  ;;  %301 = vmatprep.mubr.f32.mxu1 %v523_v16 }
 0x129   :  { %302 = vmatmul.mubr.f32.vlgmr.msra.gmra.mxu1 %v525_v17 }
 0x1e9   :  { %v456_v32 = vpop.f32.mrf.mxu1 }
 0x1eb   :  { %v457_v34 = vpop.f32.mrf.mxu1 }
 0x1ec   :  { %v458_v35 = vadd.f32 %v457_v34, %v456_v32 }
 0x1ee   :  { %v304_v36 = vadd.f32 %v458_v35, %v422_v33 }
 0x1f0   :  { %v307_v37 = vmul.f32 0.5, %v304_v36 }
 0x1f2   :  { %526 = vtanh.f32 %v307_v37 }
 0x1ff   :  { %v527_v38 = vpop.eup %526 }
 0x200   :  { %v309_v39 = vmul.f32 0.5, %v527_v38 }
 0x202   :  { %v310_v40 = vadd.f32 0.5, %v309_v39 }
 0x204   :  { %509 = vmatmul.mubr.f32.vlgmr.msra.gmra.mxu0 %v310_v40 }
 0x2c4   :  { %v400_v0 = vpop.f32.mrf.mxu0 }
 0x2c5   :  { %v401_v42 = vadd.f32 %v423_v41, %v400_v0 }
 0x2c6   :  { %v510_v43 = vpop.f32.mrf.mxu0 }
 0x2c7   :  { %404 = vst [vmem:[#allocation10] sm:$0xff] %v401_v42 }
 0x2c8   :  { %619 = shalt.err (!%p616_p10)
}
 0x2c9   :  { %414 = dma.vmem_to_hbm [thread:$0]  %s412_s27, 128, %s736_s7, [#allocation4]  }
 0x2ca   :  { %634 = dma.done.wait [#allocation4], 128  }
 0x2cb   :  { %635 = vsyncadd [#allocation4], 4294967168 }
 0x2cc   :  { %418 = vsyncpa [#allocation3], 1 }
 0x2cd   :  { %419 = vsyncpa [#allocation6], 1 }
 0x2ce   :  { %420 = vsyncpa [#allocation9], 1 }
 0x2cf   :  { %421 = vsyncpa [#allocation4], 1 }

</bundles_post_ra>
